<compile_context>
chip_gen: v6e
topology: v6e:2x2x1
jax: 0.10.0
libtpu: 0.0.40
codegen_flags: <defaults>
</compile_context>

<pallas_src>
import math

import jax
import jax.numpy as jnp
from jax.experimental import pallas as pl
from jax.experimental.pallas import tpu as pltpu

LIMIT_A, LIMIT_B, EPSILON = -0.1, 1.1, 1e-6
_LANE = 128


# ------------------------------- Pallas kernel -------------------------------

def _l0gate_kernel(x_ref, logit_ref, o_ref):
    """out = x * hardtanh(sigmoid(pre_gate_logits) * (limit_b-limit_a) + limit_a, 0, 1).

    `logit_ref` is a tiny f32 block that is either
      (tile_r, 1)       per-row gate column     (main (B*C, spatial) layout),
      (1, tile_l)       per-lane gate row       (small-spatial eval fold), or
      (tile_r, tile_l)  elementwise gate        (2-D (B, C) inputs in training);
    jnp broadcasting in the multiply covers all three.  Gate math (EUP sigmoid,
    VPU clip) touches only that tiny block, so it is free in this
    HBM-bandwidth-bound kernel.
    """
    g = jax.nn.sigmoid(logit_ref[...].astype(jnp.float32))
    mask = jnp.clip(g * (LIMIT_B - LIMIT_A) + LIMIT_A, 0.0, 1.0)
    o_ref[...] = (x_ref[...].astype(jnp.float32) * mask).astype(o_ref.dtype)


# ------------------------------- tiling helpers -------------------------------

def _round_up(v, m):
    return -(-v // m) * m


def _sublane_granule(itemsize):
    # f32/i32 -> 8, bf16/f16 -> 16, int8/fp8 -> 32 (sub-32-bit packs sublanes).
    return 8 * max(1, 4 // max(1, itemsize))


def _plan_tiles(n_rows, n_lanes, itemsize, *, target_tile_bytes=4 << 20,
                max_tile_rows=2048, min_steps=2):
    """Pick a (tile_r, tile_l) block for a (n_rows, n_lanes) streaming slab."""
    sub = _sublane_granule(itemsize)

    # ---- lane (last-dim) tile: keep the full extent unless even a single
    # granule of rows blows the byte budget (huge spatial feature maps). -----
    if n_lanes <= _LANE or sub * n_lanes * itemsize <= target_tile_bytes:
        tile_l = n_lanes                                   # full extent: legal
    else:
        tile_l = (target_tile_bytes // (sub * itemsize)) // _LANE * _LANE
        tile_l = int(max(_LANE, min(tile_l, (n_lanes // _LANE) * _LANE)))

    # ---- row tile: fill the byte budget, dtype-granule aligned.  Capped so a
    # (tile_r, 1) gate column's 128-lane VMEM padding stays small.
    # TODO(synk): a lane-major (1, rows) gate input would remove that padding
    # entirely but needs an in-kernel lane->sublane relayout.
    row_bytes = max(1, tile_l * itemsize)
    tile_r = (target_tile_bytes // row_bytes) // sub * sub
    tile_r = int(max(sub, min(tile_r, max_tile_rows)))
    if tile_r >= n_rows:
        tile_r = n_rows                                    # full extent: legal

    # ---- never collapse a non-trivial slab to a single grid step, so v7x's
    # two TensorCores can both be given work via "parallel" semantics. -------
    slab_bytes = n_rows * n_lanes * itemsize
    steps = pl.cdiv(n_rows, tile_r) * pl.cdiv(n_lanes, tile_l)
    if steps < min_steps and slab_bytes >= (1 << 20):
        if n_rows > sub:
            tile_r = int(min(n_rows,
                             max(sub, _round_up(-(-n_rows // min_steps), sub))))
        elif n_lanes > _LANE and tile_l == n_lanes:
            tile_l = int(max(_LANE, _round_up(-(-n_lanes // min_steps), _LANE)))
    return tile_r, tile_l


def _vmem_limit_bytes(tile_r, tile_l, itemsize, gate_block):
    """Explicit scoped-VMEM request from the actual pipelined footprint."""
    x_bytes = tile_r * tile_l * itemsize                  # one x / out buffer
    gr, gl = gate_block                                   # f32 gate block, padded
    g_bytes = _round_up(gr, 8) * _round_up(gl, _LANE) * 4
    need = 4 * x_bytes + 2 * g_bytes + (8 << 20)          # dbl-buffered + slack
    # floor at the usual 32 MiB default, cap below physical VMEM on all gens.
    return int(min(96 << 20, max(32 << 20, need)))


# ------------------------------- Python wrapper -------------------------------

def l0gate_forward(x, qz_loga, *, key=None, temperature=2.0 / 3.0,
                   fix_and_open_gate=False, is_train=True,
                   target_tile_bytes=4 << 20, tile_rows=None, tile_lanes=None,
                   donate_input=False):
    """Forward pass of L0Gate.

    x:        (B, C, *spatial)   -- NCHW-style, matches the PyTorch module
    qz_loga:  (C,)               -- gate log-alpha parameters
    """
    if fix_and_open_gate:
        return x                                          # identity, as in PyTorch

    assert x.ndim >= 2, "only support input_.ndim >= 2"
    B, C = x.shape[0], x.shape[1]
    assert C == qz_loga.shape[0], "mask dim must equal input_.shape[1]"

    spatial = math.prod(x.shape[2:]) if x.ndim > 2 else 1
    itemsize = x.dtype.itemsize
    qz32 = qz_loga.astype(jnp.float32)

    # ---- pre-gate logits per (b, c): tiny O(B*C) XLA work in the wrapper.
    # Removes one kernel input stream / per-step DMA / double-buffered column.
    if is_train:
        assert key is not None, "training path needs a PRNG key"
        u = jax.random.uniform(key, (B, C), dtype=jnp.float32,
                               minval=EPSILON, maxval=1.0 - EPSILON)
        logits_bc = (jnp.log(u) - jnp.log(1.0 - u) + qz32[None, :]) / temperature
    else:
        logits_bc = None

    # ---- layout selection ----------------------------------------------------
    # TODO(synk): small-spatial (1 < spatial < 128) *training* keeps the
    # (B*C, spatial) row layout (lane-sparse stores); a lane-folded variant
    # would need an in-kernel (b,c)->(b, c*spatial) lane expansion (relayout)
    # or an extra x-sized expanded-mask stream, neither clearly a win.
    use_fold = (spatial < _LANE) and ((not is_train) or spatial == 1)

    if use_fold:
        R, L = B, C * spatial
        x2d = x.reshape(R, L)
        if is_train:                       # spatial == 1: elementwise gate block
            gate, gate_kind = logits_bc, "full"
        else:                              # per-channel gate along folded lanes
            row = qz32[None, :]
            gate = jnp.repeat(row, spatial, axis=1) if spatial > 1 else row
            gate_kind = "row"
    else:
        R, L = B * C, spatial
        x2d = x.reshape(R, L)
        if is_train:
            gate = logits_bc.reshape(R, 1)
        else:
            gate = jnp.broadcast_to(qz32[None, :], (B, C)).reshape(R, 1)
        gate_kind = "col"

    # ---- tiling ---------------------------------------------------------------
    tile_r, tile_l = _plan_tiles(R, L, itemsize,
                                 target_tile_bytes=target_tile_bytes)
    if tile_rows is not None:              # explicit override (tests / tuning)
        tile_r = int(min(tile_rows, R))
    if tile_lanes is not None:
        tile_l = int(min(tile_lanes, L))
    grid = (pl.cdiv(R, tile_r), pl.cdiv(L, tile_l))

    x_spec = pl.BlockSpec((tile_r, tile_l), lambda i, j: (i, j))
    if gate_kind == "col":
        gate_block = (tile_r, 1)
        g_spec = pl.BlockSpec(gate_block, lambda i, j: (i, 0))
    elif gate_kind == "row":
        gate_block = (1, tile_l)
        g_spec = pl.BlockSpec(gate_block, lambda i, j: (0, j))
    else:  # "full"
        gate_block = (tile_r, tile_l)
        g_spec = pl.BlockSpec(gate_block, lambda i, j: (i, j))

    cparams = pltpu.CompilerParams(
        dimension_semantics=("parallel", "parallel"),
        vmem_limit_bytes=_vmem_limit_bytes(tile_r, tile_l, itemsize, gate_block))

    out2d = pl.pallas_call(
        _l0gate_kernel,
        out_shape=jax.ShapeDtypeStruct(x2d.shape, x2d.dtype),
        grid=grid,
        in_specs=[x_spec, g_spec],
        out_specs=x_spec,
        compiler_params=cparams,
        input_output_aliases=({0: 0} if donate_input else {}),
    )(x2d, gate)
    return out2d.reshape(x.shape)


# ---------------------------- pure-JAX references ----------------------------

def _ref_train(x, qz_loga, u, temperature):
    s = jax.nn.sigmoid(
        (jnp.log(u) - jnp.log(1.0 - u) + qz_loga[None, :]) / temperature)
    mask = jnp.clip(s * (LIMIT_B - LIMIT_A) + LIMIT_A, 0.0, 1.0)
    mask = mask.reshape(mask.shape + (1,) * (x.ndim - 2))
    return (x.astype(jnp.float32) * mask).astype(x.dtype)


def _ref_eval(x, qz_loga):
    pi = jax.nn.sigmoid(qz_loga.astype(jnp.float32))
    mask = jnp.clip(pi * (LIMIT_B - LIMIT_A) + LIMIT_A, 0.0, 1.0)
    mask = mask.reshape((1, -1) + (1,) * (x.ndim - 2))
    return (x.astype(jnp.float32) * mask).astype(x.dtype)


# ----------------------------------- main -----------------------------------

if __name__ == "__main__":
    key = jax.random.PRNGKey(0)
    k_x, k_qz, k_u, k_x2, k_u2, k_x3, k_x4, k_u4 = jax.random.split(key, 8)

    temperature = 2.0 / 3.0
    droprate_init = 0.5
    qz_mean = math.log(1.0 - droprate_init) - math.log(droprate_init)

    # ---- 1) main layout, f32 (2, 4, 16, 16): train + eval ----
    B, C, H, W = 2, 4, 16, 16
    x = jax.random.normal(k_x, (B, C, H, W), dtype=jnp.float32)
    qz = qz_mean + 0.01 * jax.random.normal(k_qz, (C,), dtype=jnp.float32)

    out_tr = jax.block_until_ready(
        l0gate_forward(x, qz, key=k_u, temperature=temperature,
                       fix_and_open_gate=False, is_train=True))
    u = jax.random.uniform(k_u, (B, C), dtype=jnp.float32,
                           minval=EPSILON, maxval=1.0 - EPSILON)
    assert jnp.allclose(out_tr, _ref_train(x, qz, u, temperature),
                        atol=1e-5, rtol=1e-5), "train mismatch"

    out_ev = jax.block_until_ready(
        l0gate_forward(x, qz, temperature=temperature,
                       fix_and_open_gate=False, is_train=False))
    assert jnp.allclose(out_ev, _ref_eval(x, qz), atol=1e-5, rtol=1e-5), "eval mismatch"

    # ---- 2) fix_and_open_gate=True -> identity (module default config) ----
    out_id = jax.block_until_ready(l0gate_forward(x, qz, fix_and_open_gate=True))
    assert jnp.allclose(out_id, x), "identity mismatch"

    # ---- 3) multi-step 2-D grid with padded tail row tile (R=15, 2x2 grid) ----
    B2, C2 = 3, 5
    x2 = jax.random.normal(k_x2, (B2, C2, H, W), dtype=jnp.float32)
    qz2 = qz_mean + 0.01 * jax.random.normal(k_qz, (C2,), dtype=jnp.float32)
    out2 = jax.block_until_ready(
        l0gate_forward(x2, qz2, key=k_u2, temperature=temperature,
                       fix_and_open_gate=False, is_train=True,
                       tile_rows=8, tile_lanes=128))
    u2 = jax.random.uniform(k_u2, (B2, C2), dtype=jnp.float32,
                            minval=EPSILON, maxval=1.0 - EPSILON)
    assert jnp.allclose(out2, _ref_train(x2, qz2, u2, temperature),
                        atol=1e-5, rtol=1e-5), "tiled train mismatch"

    out2e = jax.block_until_ready(
        l0gate_forward(x2, qz2, temperature=temperature, fix_and_open_gate=False,
                       is_train=False, tile_rows=8, tile_lanes=128))
    assert jnp.allclose(out2e, _ref_eval(x2, qz2),
                        atol=1e-5, rtol=1e-5), "tiled eval mismatch"

    # ---- 4) small-spatial eval fold: 7x7 maps -> lane-dense (B, C*49) slab ----
    B3, C3 = 4, 8
    x3 = jax.random.normal(k_x3, (B3, C3, 7, 7), dtype=jnp.float32)
    qz3 = qz_mean + 0.01 * jax.random.normal(k_qz, (C3,), dtype=jnp.float32)
    out3 = jax.block_until_ready(
        l0gate_forward(x3, qz3, fix_and_open_gate=False, is_train=False))
    assert jnp.allclose(out3, _ref_eval(x3, qz3),
                        atol=1e-5, rtol=1e-5), "fold eval mismatch"

    # ---- 5) 2-D input (B, C), training -> elementwise gate block ----
    B4, C4 = 6, 160
    x4 = jax.random.normal(k_x4, (B4, C4), dtype=jnp.float32)
    qz4 = qz_mean + 0.01 * jax.random.normal(k_qz, (C4,), dtype=jnp.float32)
    out4 = jax.block_until_ready(
        l0gate_forward(x4, qz4, key=k_u4, temperature=temperature,
                       fix_and_open_gate=False, is_train=True))
    u4 = jax.random.uniform(k_u4, (B4, C4), dtype=jnp.float32,
                            minval=EPSILON, maxval=1.0 - EPSILON)
    assert jnp.allclose(out4, _ref_train(x4, qz4, u4, temperature),
                        atol=1e-5, rtol=1e-5), "2-D train mismatch"

    # ---- 6) bf16 activations, eval (dtype-aware sublane granule path) ----
    x5 = x.astype(jnp.bfloat16)
    out5 = jax.block_until_ready(
        l0gate_forward(x5, qz, temperature=temperature,
                       fix_and_open_gate=False, is_train=False))
    assert jnp.allclose(out5.astype(jnp.float32),
                        _ref_eval(x5, qz).astype(jnp.float32),
                        atol=2e-2, rtol=2e-2), "bf16 eval mismatch"

    print("KERNEL_OK")
</pallas_src>

<mosaic_0001>
module attributes {stable_mosaic.version = 11 : i64} {
  func.func @_l0gate_kernel(%arg0: i32, %arg1: i32, %arg2: memref<8x256xf32, #tpu.memory_space<vmem>>, %arg3: memref<8x1xf32, #tpu.memory_space<vmem>>, %arg4: memref<8x256xf32, #tpu.memory_space<vmem>>) attributes {dimension_semantics = [#tpu.dimension_semantics<parallel>, #tpu.dimension_semantics<parallel>], iteration_bounds = array<i64: 1, 1>, scalar_prefetch = 0 : i64, scratch_operands = 0 : i64, tpu.core_type = #tpu.core_type<tc>, window_params = [{transform_indices = @transform_0, window_bounds = array<i64: 8, 256>}, {transform_indices = @transform_1, window_bounds = array<i64: 8, 1>}, {transform_indices = @transform_2, window_bounds = array<i64: 8, 256>}]} {
    %c0 = arith.constant 0 : index
    %c0_0 = arith.constant 0 : index
    %0 = vector.load %arg3[%c0, %c0_0] : memref<8x1xf32, #tpu.memory_space<vmem>>, vector<8x1xf32>
    %1 = arith.negf %0 : vector<8x1xf32>
    %2 = math.exp %1 : vector<8x1xf32>
    %cst = arith.constant 1.000000e+00 : f32
    %3 = vector.broadcast %cst : f32 to vector<8x1xf32>
    %4 = arith.addf %3, %2 : vector<8x1xf32>
    %5 = arith.divf %3, %4 : vector<8x1xf32>
    %cst_1 = arith.constant 1.200000e+00 : f32
    %6 = vector.broadcast %cst_1 : f32 to vector<8x1xf32>
    %7 = arith.mulf %5, %6 : vector<8x1xf32>
    %cst_2 = arith.constant -1.000000e-01 : f32
    %8 = vector.broadcast %cst_2 : f32 to vector<8x1xf32>
    %9 = arith.addf %7, %8 : vector<8x1xf32>
    %cst_3 = arith.constant 0.000000e+00 : f32
    %cst_4 = arith.constant 1.000000e+00 : f32
    %10 = vector.broadcast %cst_3 : f32 to vector<8x1xf32>
    %11 = arith.maximumf %10, %9 : vector<8x1xf32>
    %12 = vector.broadcast %cst_4 : f32 to vector<8x1xf32>
    %13 = arith.minimumf %12, %11 : vector<8x1xf32>
    %c0_5 = arith.constant 0 : index
    %c0_6 = arith.constant 0 : index
    %14 = vector.load %arg2[%c0_5, %c0_6] : memref<8x256xf32, #tpu.memory_space<vmem>>, vector<8x256xf32>
    %15 = vector.broadcast %13 : vector<8x1xf32> to vector<8x256xf32>
    %16 = arith.mulf %14, %15 : vector<8x256xf32>
    %c0_7 = arith.constant 0 : index
    %c0_8 = arith.constant 0 : index
    %17 = vector.load %arg4[%c0_7, %c0_8] : memref<8x256xf32, #tpu.memory_space<vmem>>, vector<8x256xf32>
    tpu.vector_store %arg4[%c0_7, %c0_8], %16 {strides = array<i32>} : memref<8x256xf32, #tpu.memory_space<vmem>>, vector<8x256xf32>,
    return
  }
  func.func @transform_0(%arg0: i32, %arg1: i32) -> (i32, i32) {
    %c0_i32 = arith.constant 0 : i32
    return %arg0, %arg1 : i32, i32
  }
  func.func @transform_1(%arg0: i32, %arg1: i32) -> (i32, i32) {
    %c0_i32 = arith.constant 0 : i32
    %c0_i32_0 = arith.constant 0 : i32
    return %arg0, %c0_i32 : i32, i32
  }
  func.func @transform_2(%arg0: i32, %arg1: i32) -> (i32, i32) {
    %c0_i32 = arith.constant 0 : i32
    return %arg0, %arg1 : i32, i32
  }
}

</mosaic_0001>

<bundles_post_ra>
// kernel: tpu_custom_call.1
= control target key start
LH: loop header
LB: loop body
LE: loop exit
PB: predicated region body
PF: predicated region fallthrough
CT: control target
= control target key end

     0   :  { %7 = vsyncpa [#allocation3], 0  ;;  %s141_s0 = inlined_call_operand.hbm [shape: f32[8,256], index: 0, kind: input, shape index: {}]   ;;  %s142_s1 = inlined_call_operand.vmem [shape: f32[8,1], index: 1, kind: input, shape index: {}]   ;;  %s143_s2 = inlined_call_operand.hbm [shape: f32[8,256], index: 2, kind: output, shape index: {}]  }
   0x1   :  { %8 = vsyncpa [#allocation4], 0  ;;  %s114_s9 = smov [#allocation2]  }
   0x2   :  { %s15_s10 = sshll.u32 %s114_s9, 4  ;;  %s16_s10 = int_to_ptr.vmem [resolvable:$true] %s15_s10 }
   0x3   :  { %s78_s11 = scalar_lea.vmem %s16_s10, 256  ;;  %p83_p1 = scmp.lt.s32.totalorder %s16_s10, %s16_s10 }
   0x4   :  { %p79_p0 = scmp.ne.s32.totalorder %s16_s10, %s78_s11  ;;  %p84_p2 = scmp.lt.s32.totalorder %s78_s11, %s78_s11 }
   0x6   :  { %p85_p3 = por %p84_p2, %p83_p1 }
   0x8   :  { %p86_p4 = pnand %p85_p3, %p79_p0 }
   0xa   :  { %89 = shalt.err (!%p86_p4)
}
   0xb   :  { %18 = dma.hbm_to_vmem [thread:$0]  %s141_s0, 256, %s16_s10, [#allocation3]  }
   0xc   :  { %110 = dma.done.wait [#allocation3], 256  }
   0xd   :  { %111 = vsyncadd [#allocation3], 4294967040  ;;  %v115_v0 = vmov 0   ;;  %v24_v1 = vld [vmem:[%s142_s1] sm:$0xff]  ;;  %v36_v11 = vld [vmem:[#allocation2 + $0x8] sm:$0xff]  ;;  %s116_s0 = smov [#allocation5]  }
   0xe   :  { %65 = vset.pattern.permute.xlu0 %v115_v0  ;;  %v61_v2 = vmul.f32 -1.442695, %v24_v1  ;;  %v35_v10 = vld [vmem:[#allocation2] sm:$0xff]  ;;  %s52_s16 = sshll.u32 %s116_s0, 4  ;;  %s53_s16 = int_to_ptr.vmem [resolvable:$true] %s52_s16 }
   0xf   :  { %s90_s1 = scalar_lea.vmem %s53_s16, 256  ;;  %p95_p6 = scmp.lt.s32.totalorder %s53_s16, %s53_s16 }
  0x10   :  { %66 = vpow2.f32 %v61_v2  ;;  %p91_p5 = scmp.ne.s32.totalorder %s53_s16, %s90_s1  ;;  %p96_p7 = scmp.lt.s32.totalorder %s90_s1, %s90_s1 }
  0x12   :  { %p97_p8 = por %p96_p7, %p95_p6 }
  0x14   :  { %p98_p9 = pnand %p97_p8, %p91_p5 }
  0x1d   :  { %v67_v3 = vpop.eup %66 }
  0x1e   :  { %v28_v4 = vadd.f32 1.0, %v67_v3 }
  0x20   :  { %68 = vrcp.f32 %v28_v4 }
  0x2d   :  { %v69_v5 = vpop.eup %68 }
  0x2e   :  { %v31_v6 = vmul.f32 1.2, %v69_v5 }
  0x30   :  { %v32_v7 = vadd.f32 -0.1, %v31_v6 }
  0x32   :  { %v33_v8 = vmax.f32 %v32_v7, 0.0 }
  0x34   :  { %v34_v9 = vmin.f32 %v33_v8, 1.0 }
  0x36   :  { %39 = vperm.xlu0 %65, %v34_v9  }
  0xb1   :  { %v40_v12 = vpop.permute.xlu0 %39 }
  0xb2   :  { %v42_v13 = vmul.f32 %v40_v12, %v35_v10  ;;  %v43_v14 = vmul.f32 %v40_v12, %v36_v11 }
  0xb4   :  { %44 = vst [vmem:[#allocation5] sm:$0xff] %v42_v13  ;;  %45 = vst [vmem:[#allocation5 + $0x8] sm:$0xff] %v43_v14 }
  0xb5   :  { %101 = shalt.err (!%p98_p9)
}
  0xb6   :  { %55 = dma.vmem_to_hbm [thread:$0]  %s53_s16, 256, %s143_s2, [#allocation4]  }
  0xb7   :  { %112 = dma.done.wait [#allocation4], 256  }
  0xb8   :  { %113 = vsyncadd [#allocation4], 4294967040 }
  0xb9   :  { %59 = vsyncpa [#allocation3], 1 }
  0xba   :  { %60 = vsyncpa [#allocation4], 1 }

</bundles_post_ra>
